<compile_context>
chip_gen: v6e
topology: v6e:2x2x1
jax: 0.10.0
libtpu: 0.0.40
codegen_flags: <defaults>
</compile_context>

<pallas_src>
import functools

import jax
import jax.numpy as jnp
import numpy as np
from jax.experimental import pallas as pl
from jax.experimental.pallas import tpu as pltpu


def _feature_crop_kernel(box_ref, x_ref, o_ref, *, inv_hm1, inv_wm1):
    # box_ref: (B, 4) f32 scalar-prefetch (SMEM); x_ref/o_ref: (1, C, H, W) VMEM blocks.
    _, C, H, W = x_ref.shape
    b = pl.program_id(0)
    x1 = box_ref[b, 0]
    y1 = box_ref[b, 1]
    x2 = box_ref[b, 2]
    y2 = box_ref[b, 3]
    do_crop = (x1 + y1 + x2 + y2) > 0.0  # torch.sum(box[i]).item() > 0

    @pl.when(do_crop)
    def _crop_and_resize():
        # int() truncation (boxes are non-negative in this model -> floor).
        x1f = jnp.floor(x1)
        y1f = jnp.floor(y1)
        x2f = jnp.floor(x2)
        y2f = jnp.floor(y2)
        # align_corners=True mapping: out index i -> src = corner_offset + i * scale
        sy = (y2f - y1f - 1.0) * inv_hm1
        sx = (x2f - x1f - 1.0) * inv_wm1

        # Row interpolation matrix, channel-batched: Ry[c, u, j] = relu(1 - |src_y(u) - j|)
        u_i = jax.lax.broadcasted_iota(jnp.int32, (C, H, H), 1).astype(jnp.float32)
        j_i = jax.lax.broadcasted_iota(jnp.int32, (C, H, H), 2).astype(jnp.float32)
        ry = jnp.maximum(0.0, 1.0 - jnp.abs(y1f + u_i * sy - j_i))

        # Column interpolation matrix: Rx[k, v] = relu(1 - |src_x(v) - k|)
        k_i = jax.lax.broadcasted_iota(jnp.int32, (W, W), 0).astype(jnp.float32)
        v_i = jax.lax.broadcasted_iota(jnp.int32, (W, W), 1).astype(jnp.float32)
        rx = jnp.maximum(0.0, 1.0 - jnp.abs(x1f + v_i * sx - k_i))

        xb = x_ref[0].astype(jnp.float32)  # (C, H, W)

        # Row interpolation: batched over channels, (C,H,H) . (C,H,W) -> (C,H,W).
        t = jax.lax.dot_general(
            ry, xb,
            dimension_numbers=(((2,), (1,)), ((0,), (0,))),
            precision=jax.lax.Precision.HIGHEST,
            preferred_element_type=jnp.float32,
        )
        # Column interpolation: one lane-dense (C*H, W) @ (W, W) MXU matmul.
        out = jnp.dot(
            t.reshape(C * H, W), rx,
            precision=jax.lax.Precision.HIGHEST,
            preferred_element_type=jnp.float32,
        )
        o_ref[0] = out.reshape(C, H, W).astype(o_ref.dtype)

    @pl.when(jnp.logical_not(do_crop))
    def _passthrough():
        # Bit-exact copy; skips all R-matrix VPU work and all MXU traffic.
        o_ref[...] = x_ref[...]


def feature_crop(feature_batch, box_batch):
    """feature_batch: (B, C, H, W) float32; box_batch: (B, 4) float32 [x1, y1, x2, y2]."""
    B, C, H, W = feature_batch.shape
    box_batch = box_batch.astype(jnp.float32)

    kernel = functools.partial(
        _feature_crop_kernel,
        inv_hm1=1.0 / float(max(H - 1, 1)),   # guard degenerate H==1 / W==1
        inv_wm1=1.0 / float(max(W - 1, 1)),
    )

    return pl.pallas_call(
        kernel,
        out_shape=jax.ShapeDtypeStruct((B, C, H, W), feature_batch.dtype),
        grid_spec=pltpu.PrefetchScalarGridSpec(
            num_scalar_prefetch=1,
            grid=(B,),  # >= 2 parallel steps keeps both v7x TensorCores busy
            in_specs=[
                pl.BlockSpec((1, C, H, W), lambda b, box: (b, 0, 0, 0)),
            ],
            out_specs=pl.BlockSpec((1, C, H, W), lambda b, box: (b, 0, 0, 0)),
        ),
        compiler_params=pltpu.CompilerParams(dimension_semantics=("parallel",)),
        # Alias the feature input (flat input index 1, after the scalar-prefetch
        # box operand) onto the output: free buffer reuse when donated.
        input_output_aliases={1: 0},
    )(box_batch, feature_batch)


def _reference(feat, box):
    feat = np.asarray(feat, dtype=np.float64)
    box = np.asarray(box, dtype=np.float64)
    B, C, H, W = feat.shape
    out = feat.copy()
    for i in range(B):
        if box[i].sum() > 0:
            x1, y1, x2, y2 = [int(v) for v in box[i]]
            crop = feat[i, :, y1:y2, x1:x2]
            hc, wc = crop.shape[1], crop.shape[2]
            ys = np.linspace(0.0, hc - 1.0, H)
            xs = np.linspace(0.0, wc - 1.0, W)
            y0 = np.floor(ys).astype(int)
            yw = ys - y0
            y1i = np.clip(y0 + 1, 0, hc - 1)
            x0 = np.floor(xs).astype(int)
            xw = xs - x0
            x1i = np.clip(x0 + 1, 0, wc - 1)
            top = crop[:, y0][:, :, x0] * (1 - xw) + crop[:, y0][:, :, x1i] * xw
            bot = crop[:, y1i][:, :, x0] * (1 - xw) + crop[:, y1i][:, :, x1i] * xw
            out[i] = top * (1 - yw)[None, :, None] + bot * yw[None, :, None]
    return out


if __name__ == "__main__":
    B, C, H, W = 2, 4, 16, 16
    key = jax.random.PRNGKey(0)
    feat = jax.random.normal(key, (B, C, H, W), dtype=jnp.float32)
    # batch 0: crop box [x1, y1, x2, y2]; batch 1: all-zero box -> untouched
    box = jnp.array([[2.0, 3.0, 12.0, 14.0],
                     [0.0, 0.0, 0.0, 0.0]], dtype=jnp.float32)

    feat_np = np.asarray(feat)           # snapshot for the reference
    ref = _reference(feat_np, np.asarray(box))

    out = feature_crop(feat, box)
    out = jax.block_until_ready(out)

    np.testing.assert_allclose(np.asarray(out), ref, atol=1e-4, rtol=1e-4)
    print("KERNEL_OK")
</pallas_src>

<mosaic_0001>
module attributes {stable_mosaic.version = 11 : i64} {
  func.func @_feature_crop_kernel(%arg0: i32, %arg1: memref<2x4xf32, #tpu.memory_space<smem>>, %arg2: memref<1x4x16x16xf32, #tpu.memory_space<vmem>>, %arg3: memref<1x4x16x16xf32, #tpu.memory_space<vmem>>) attributes {dimension_semantics = [#tpu.dimension_semantics<parallel>], iteration_bounds = array<i64: 2>, scalar_prefetch = 1 : i64, scratch_operands = 0 : i64, tpu.core_type = #tpu.core_type<tc>, window_params = [{transform_indices = @transform_0, window_bounds = array<i64: 1, 4, 16, 16>}, {transform_indices = @transform_1, window_bounds = array<i64: 1, 4, 16, 16>}]} {
    %0 = arith.index_cast %arg0 : i32 to index
    %c0 = arith.constant 0 : index
    %1 = memref.load %arg1[%0, %c0] : memref<2x4xf32, #tpu.memory_space<smem>>
    %2 = arith.index_cast %arg0 : i32 to index
    %c1 = arith.constant 1 : index
    %3 = memref.load %arg1[%2, %c1] : memref<2x4xf32, #tpu.memory_space<smem>>
    %4 = arith.index_cast %arg0 : i32 to index
    %c2 = arith.constant 2 : index
    %5 = memref.load %arg1[%4, %c2] : memref<2x4xf32, #tpu.memory_space<smem>>
    %6 = arith.index_cast %arg0 : i32 to index
    %c3 = arith.constant 3 : index
    %7 = memref.load %arg1[%6, %c3] : memref<2x4xf32, #tpu.memory_space<smem>>
    %8 = arith.addf %1, %3 : f32
    %9 = arith.addf %8, %5 : f32
    %10 = arith.addf %9, %7 : f32
    %cst = arith.constant 0.000000e+00 : f32
    %11 = arith.cmpf ogt, %10, %cst : f32
    %12 = arith.extui %11 : i1 to i32
    %c0_i32 = arith.constant 0 : i32
    %13 = arith.cmpi ne, %12, %c0_i32 : i32
    scf.if %13 {
      %17 = math.floor %1 : f32
      %18 = math.floor %3 : f32
      %19 = math.floor %5 : f32
      %20 = math.floor %7 : f32
      %21 = arith.subf %20, %18 : f32
      %cst_1 = arith.constant 1.000000e+00 : f32
      %22 = arith.subf %21, %cst_1 : f32
      %cst_2 = arith.constant 0.0666666701 : f32
      %23 = arith.mulf %22, %cst_2 : f32
      %24 = arith.subf %19, %17 : f32
      %cst_3 = arith.constant 1.000000e+00 : f32
      %25 = arith.subf %24, %cst_3 : f32
      %cst_4 = arith.constant 0.0666666701 : f32
      %26 = arith.mulf %25, %cst_4 : f32
      %27 = tpu.iota {dimensions = array<i32: 1>} : vector<4x16x16xi32>
      %28 = arith.sitofp %27 : vector<4x16x16xi32> to vector<4x16x16xf32>
      %29 = tpu.iota {dimensions = array<i32: 2>} : vector<4x16x16xi32>
      %30 = arith.sitofp %29 : vector<4x16x16xi32> to vector<4x16x16xf32>
      %31 = vector.broadcast %23 : f32 to vector<4x16x16xf32>
      %32 = arith.mulf %28, %31 : vector<4x16x16xf32>
      %33 = vector.broadcast %18 : f32 to vector<4x16x16xf32>
      %34 = arith.addf %33, %32 : vector<4x16x16xf32>
      %35 = arith.subf %34, %30 : vector<4x16x16xf32>
      %36 = math.absf %35 : vector<4x16x16xf32>
      %cst_5 = arith.constant 1.000000e+00 : f32
      %37 = vector.broadcast %cst_5 : f32 to vector<4x16x16xf32>
      %38 = arith.subf %37, %36 : vector<4x16x16xf32>
      %cst_6 = arith.constant 0.000000e+00 : f32
      %39 = vector.broadcast %cst_6 : f32 to vector<4x16x16xf32>
      %40 = arith.maximumf %39, %38 : vector<4x16x16xf32>
      %41 = tpu.iota {dimensions = array<i32: 0>} : vector<16x16xi32>
      %42 = arith.sitofp %41 : vector<16x16xi32> to vector<16x16xf32>
      %43 = tpu.iota {dimensions = array<i32: 1>} : vector<16x16xi32>
      %44 = arith.sitofp %43 : vector<16x16xi32> to vector<16x16xf32>
      %45 = vector.broadcast %26 : f32 to vector<16x16xf32>
      %46 = arith.mulf %44, %45 : vector<16x16xf32>
      %47 = vector.broadcast %17 : f32 to vector<16x16xf32>
      %48 = arith.addf %47, %46 : vector<16x16xf32>
      %49 = arith.subf %48, %42 : vector<16x16xf32>
      %50 = math.absf %49 : vector<16x16xf32>
      %cst_7 = arith.constant 1.000000e+00 : f32
      %51 = vector.broadcast %cst_7 : f32 to vector<16x16xf32>
      %52 = arith.subf %51, %50 : vector<16x16xf32>
      %cst_8 = arith.constant 0.000000e+00 : f32
      %53 = vector.broadcast %cst_8 : f32 to vector<16x16xf32>
      %54 = arith.maximumf %53, %52 : vector<16x16xf32>
      %c0_9 = arith.constant 0 : index
      %c0_10 = arith.constant 0 : index
      %c0_11 = arith.constant 0 : index
      %c0_12 = arith.constant 0 : index
      %55 = vector.load %arg2[%c0_9, %c0_10, %c0_11, %c0_12] : memref<1x4x16x16xf32, #tpu.memory_space<vmem>>, vector<1x4x16x16xf32>
      %56 = vector.shape_cast %55 : vector<1x4x16x16xf32> to vector<4x16x16xf32>
      %cst_13 = arith.constant dense<0.000000e+00> : vector<4x16x16xf32>
      %57 = tpu.matmul %40, %56, %cst_13 {dimension_numbers = #tpu.dot_dimension_numbers<[2], [1], [1], [2], [0, 0, 0, 1, 1, 2], [0], [0]>, precision = #tpu.contract_precision<fp32>} : vector<4x16x16xf32>, vector<4x16x16xf32>, vector<4x16x16xf32> -> vector<4x16x16xf32>
      %58 = vector.shape_cast %57 : vector<4x16x16xf32> to vector<64x16xf32>
      %cst_14 = arith.constant dense<0.000000e+00> : vector<64x16xf32>
      %59 = tpu.matmul %58, %54, %cst_14 {dimension_numbers = #tpu.dot_dimension_numbers<[1], [0], [0], [1], [0, 0, 1, 1], [], []>, precision = #tpu.contract_precision<fp32>} : vector<64x16xf32>, vector<16x16xf32>, vector<64x16xf32> -> vector<64x16xf32>
      %60 = vector.shape_cast %59 : vector<64x16xf32> to vector<4x16x16xf32>
      %c0_15 = arith.constant 0 : index
      %c0_16 = arith.constant 0 : index
      %c0_17 = arith.constant 0 : index
      %c0_18 = arith.constant 0 : index
      %61 = vector.load %arg3[%c0_15, %c0_16, %c0_17, %c0_18] : memref<1x4x16x16xf32, #tpu.memory_space<vmem>>, vector<1x4x16x16xf32>
      %62 = vector.shape_cast %61 : vector<1x4x16x16xf32> to vector<4x16x16xf32>
      %63 = vector.shape_cast %60 : vector<4x16x16xf32> to vector<1x4x16x16xf32>
      tpu.vector_store %arg3[%c0_15, %c0_16, %c0_17, %c0_18], %63 {strides = array<i32>} : memref<1x4x16x16xf32, #tpu.memory_space<vmem>>, vector<1x4x16x16xf32>,
    } else {
    }
    %true = arith.constant true
    %14 = arith.xori %11, %true : i1
    %15 = arith.extui %14 : i1 to i32
    %c0_i32_0 = arith.constant 0 : i32
    %16 = arith.cmpi ne, %15, %c0_i32_0 : i32
    scf.if %16 {
      %c0_1 = arith.constant 0 : index
      %c0_2 = arith.constant 0 : index
      %c0_3 = arith.constant 0 : index
      %c0_4 = arith.constant 0 : index
      %17 = vector.load %arg2[%c0_1, %c0_2, %c0_3, %c0_4] : memref<1x4x16x16xf32, #tpu.memory_space<vmem>>, vector<1x4x16x16xf32>
      %c0_5 = arith.constant 0 : index
      %c0_6 = arith.constant 0 : index
      %c0_7 = arith.constant 0 : index
      %c0_8 = arith.constant 0 : index
      %18 = vector.load %arg3[%c0_5, %c0_6, %c0_7, %c0_8] : memref<1x4x16x16xf32, #tpu.memory_space<vmem>>, vector<1x4x16x16xf32>
      tpu.vector_store %arg3[%c0_5, %c0_6, %c0_7, %c0_8], %17 {strides = array<i32>} : memref<1x4x16x16xf32, #tpu.memory_space<vmem>>, vector<1x4x16x16xf32>,
    } else {
    }
    return
  }
  func.func @transform_0(%arg0: i32, %arg1: memref<2x4xf32, #tpu.memory_space<smem>>) -> (i32, i32, i32, i32) {
    %c0_i32 = arith.constant 0 : i32
    %c0_i32_0 = arith.constant 0 : i32
    %c0_i32_1 = arith.constant 0 : i32
    %c0_i32_2 = arith.constant 0 : i32
    return %arg0, %c0_i32, %c0_i32_0, %c0_i32_1 : i32, i32, i32, i32
  }
  func.func @transform_1(%arg0: i32, %arg1: memref<2x4xf32, #tpu.memory_space<smem>>) -> (i32, i32, i32, i32) {
    %c0_i32 = arith.constant 0 : i32
    %c0_i32_0 = arith.constant 0 : i32
    %c0_i32_1 = arith.constant 0 : i32
    %c0_i32_2 = arith.constant 0 : i32
    return %arg0, %c0_i32, %c0_i32_0, %c0_i32_1 : i32, i32, i32, i32
  }
}

</mosaic_0001>

<bundles_post_ra>
// kernel: tpu_custom_call.1
= control target key start
LH: loop header
LB: loop body
LE: loop exit
PB: predicated region body
PF: predicated region fallthrough
CT: control target
= control target key end

     0   :  { %s4301_s0 = inlined_call_operand.vmem [shape: f32[2,4], index: 0, kind: input, shape index: {}]   ;;  %s4302_s1 = inlined_call_operand.hbm [shape: f32[2,4,16,16], index: 1, kind: input, shape index: {}, may-alias: {1,2}]   ;;  %s4303_s2 = inlined_call_operand.hbm [shape: f32[2,4,16,16], index: 2, kind: output, shape index: {}, may-alias: {1,2}]  }
   0x1   :  { %s7_s11 = sshll.u32 %s4301_s0, 4  ;;  %s8_s11 = int_to_ptr.vmem [resolvable:$true] %s7_s11 }
   0x2   :  { %s3613_s12 = scalar_lea.vmem %s8_s11, 32  ;;  %p3618_p1 = scmp.lt.s32.totalorder %s8_s11, %s8_s11 }
   0x3   :  { %p3614_p0 = scmp.ne.s32.totalorder %s8_s11, %s3613_s12  ;;  %p3619_p2 = scmp.lt.s32.totalorder %s3613_s12, %s3613_s12 }
   0x5   :  { %p3620_p3 = por %p3619_p2, %p3618_p1 }
   0x7   :  { %p3621_p4 = pnand %p3620_p3, %p3614_p0 }
   0x9   :  { %3624 = shalt.err (!%p3621_p4)  }
   0xa   :  { %s3721_s13 = smov [#allocation3]  }
   0xb   :  { %10 = dma.vmem_to_smem %s8_s11, 32, %s3721_s13, [#allocation2] }
   0xc   :  { %3695 = dma.done.wait [#allocation2], 32 }
   0xd   :  { %3696 = vsyncadd [#allocation2], 4294967264 }
   0xe   :  { %12 = sfence }
   0xf   :  { %13 = vsyncpa [#allocation5], 0 }
  0x10   :  { %15 = vsyncpa [#allocation5 + $0x1], 0 }
  0x11   :  { %16 = vsyncpa [#allocation6], 0 }
  0x12   :  { %18 = vsyncpa [#allocation6 + $0x1], 0  ;;  %s3746_s14 = smov 0   ;;  %s3748_s0 = smov 0  }
  0x13   :  { %s3750_s15 = smov 0   ;;  %s3752_s16 = smov 0  }
  0x14 LB: > { %s3767_s17 = sadd.s32 4294967295, %s3719_s16   ;;  %s3123_s18 = sadd.s32 4294967294, %s3719_s16   ;;  %s3719_s16 = sphi %s3752_s16, %s4319_s16   ;;  %s3715_s15 = sphi %s3750_s15, %s4318_s15   ;;  %s3711_s0 = sphi %s3748_s0, %s4317_s0   ;;  %s3707_s14 = sphi %s3746_s14, %s4316_s14  }
  0x15   : > { %s3771_s19 = sadd.s32 1, %s3719_s16   ;;  %s31_s20 = sadd.s32 1, %s3715_s15 }
  0x16   : > { %s28_s21 = ssub.s32 %s3719_s16, %s3771_s19  ;;  %p38_p5 = scmp.ne.s32.totalorder %s3715_s15, %s3711_s0 }
  0x17   : > { %p29_p6 = scmp.eq.s32.totalorder %s28_s21, 0  ;;  %p39_p7 = scmp.eq.s32.totalorder %s3719_s16, 0 }
  0x18   : > { %p44_p8 = scmp.ne.s32.totalorder %s3711_s0, %s3707_s14  ;;  %p45_p9 = scmp.eq.s32.totalorder %s3767_s17, 0 }
  0x19   : > { %s3783_s22 = scalar_select %p29_p6, %s3715_s15, %s31_s20  }
  0x1a   : > { %p3785_p10 = por %p39_p7, %p38_p5  ;;  %p3789_p11 = por %p45_p9, %p44_p8 }
  0x1b   : > { %p68_p12 = scmp.eq.s32.totalorder %s3767_s17, 1  ;;  %p74_p13 = scmp.eq.s32.totalorder %s3123_s18, 1 }
  0x1c   : > { %s4307_s24 = scalar_select %p3789_p11, 1, 0 }
  0x1d   : > { %p3574_p1 = scmp.lt.s32.totalorder %s3719_s16, 2  ;;  %p3796_p2 = por %p68_p12, %p38_p5 }
  0x1e   : > { %p3800_p3 = por %p74_p13, %p44_p8  ;;  %s94_s27 = sand.u32 1, %s3715_s15  }
  0x1f   : > { %s4308_s25 = scalar_select %p3796_p2, 1, 0 }
  0x20   : > { %s4309_s26 = scalar_select %p3800_p3, 1, 0 }
  0x21   : > { %s3140_s28 = sshll.u32 %s3719_s16, 10  ;;  %s3126_s29 = sshll.u32 %s94_s27, 6 }
  0x22   : > { %s3809_s4 = scalar_lea.hbm %s4302_s1, %s3140_s28  ;;  %s98_s5 = scalar_lea.vmem [#allocation4], %s3126_s29 }
  0x23   : > { %s105_s6 = sshll.u32 %s98_s5, 4  ;;  %p3813_p4 = pnand %p3574_p1, %p3785_p10  ;;  %s3817_s6 = int_to_ptr.vmem [resolvable:$true] %s105_s6 }
  0x24   : > { %s3819_s8 = scalar_lea.sflag [#allocation5], %s94_s27  ;;  %s3625_s9 = scalar_lea.hbm %s3809_s4, 1024 }
  0x25   : > { %p3626_p5 = scmp.ne.s32.totalorder %s3809_s4, %s3625_s9  ;;  %p3627_p6 = pneg %p3813_p4 }
  0x26   : > { %s3630_s12 = scalar_lea.hbm %s4302_s1, 2048  ;;  %p3631_p9 = scmp.lt.s32.totalorder %s3809_s4, %s4302_s1 }
  0x27   : > { %p3628_p7 = pnand %p3627_p6, %p3626_p5  ;;  %p3632_p10 = scmp.lt.s32.totalorder %s3630_s12, %s3625_s9 }
  0x29   : > { %p3629_p8 = pneg %p3628_p7  ;;  %p3633_p12 = por %p3632_p10, %p3631_p9 }
  0x2b   : > { %p3634_p13 = pnand %p3633_p12, %p3629_p8 }
  0x2d   : > { %3637 = shalt.err (!%p3634_p13)
}
  0x2e   : > { %s3638_s20 = scalar_lea.vmem %s3817_s6, 1024  ;;  %s3722_s21 = smov [#allocation4]  }
  0x2f   : > { %p3639_p1 = scmp.ne.s32.totalorder %s3817_s6, %s3638_s20  ;;  %s3643_s23 = sshll.u32 %s3722_s21, 4  ;;  %s3644_s23 = int_to_ptr.vmem [resolvable:$false] %s3643_s23 }
  0x30   : > { %s3645_s27 = scalar_lea.vmem %s3644_s23, 2048  ;;  %p3646_p7 = scmp.lt.s32.totalorder %s3817_s6, %s3644_s23 }
  0x31   : > { %p3641_p0 = pnand %p3639_p1, %p3627_p6  ;;  %p3647_p3 = scmp.lt.s32.totalorder %s3645_s27, %s3638_s20 }
  0x33   : > { %p3642_p5 = pneg %p3641_p0  ;;  %p3648_p2 = por %p3647_p3, %p3646_p7 }
  0x35   : > { %p3649_p11 = pnand %p3648_p2, %p3642_p5 }
  0x37   : > { %3652 = shalt.err (!%p3649_p11)
}
  0x38   : > { %s3723_s28 = smov 128   ;;  %s3724_s29 = smov 8  }
  0x39   : > { %3569 = dma.hbm_to_vmem [thread:$0]  (!%p3813_p4), %s3809_s4, 1024, %s3817_s6, %s3819_s8, %s3723_s28, %s3723_s28, %s3724_s29  }
  0x3a   : > { %p3129_p0 = scmp.ge.s32.totalorder %s3719_s16, 1  ;;  %p113_p6 = scmp.lt.s32.totalorder %s3719_s16, 3 }
  0x3c   : > { %p114_p8 = pnand %p3129_p0, %p113_p6 }
  0x3d   : > { %s3843_s30 = sand.u32 (!%p114_p8), 1, %s3711_s0   ;;  %p4311_p11 = scmp.ne.s32.totalorder (!%p114_p8), %s4307_s24, 0 }
  0x3e   : > { %117 = sbr.rel (%p114_p8) target bundleno = 652 (0x28c), region = 24  ;;  %s3130_s3 = sshll.u32 (!%p114_p8), %s3843_s30, 6 }
  0x3f   : > { %s120_s5 = scalar_lea.sflag (!%p114_p8), [#allocation5], %s3843_s30  ;;  %s3847_s9 = scalar_lea.vmem (!%p114_p8), [#allocation4], %s3130_s3 }
  0x43   : > { %3698 = dma.done.wait (%p4311_p11), %s120_s5, 1024  }
  0x44   : > { %3700 = vsyncadd (%p4311_p11), %s120_s5, 4294966272  ;;  %s3132_s4 = sshll.u32 %s3767_s17, 7  ;;  %s3867_s23 = scalar_lea.vmem [#allocation7], %s3130_s3 }
  0x45   : > { %s3854_s6 = sld [smem:[#allocation3 + %s3132_s4]]  ;;  %s144_s7 = sadd.s32 1, %s3132_s4 }
  0x46   : > { %s3856_s8 = sld [smem:[#allocation3 + %s144_s7]]  ;;  %s146_s10 = sadd.s32 2, %s3132_s4 }
  0x47   : > { %s3858_s11 = sld [smem:[#allocation3 + %s146_s10]]  ;;  %s148_s12 = sadd.s32 3, %s3132_s4 }
  0x48   : > { %s149_s13 = sld [smem:[#allocation3 + %s148_s12]] }
  0x4c   : > { %s150_s18 = sadd.f32 %s3856_s8, %s3854_s6 }
  0x4e   : > { %s151_s20 = sadd.f32 %s150_s18, %s3858_s11 }
  0x50   : > { %s152_s21 = sadd.f32 %s151_s20, %s149_s13 }
  0x52   : > { %p3863_p2 = scmp.gt.f32.partialorder %s152_s21, 0.0 }
  0x53   : > { %v202_v0 = vld [vmem:[%s3847_s9 + $0x8] sm:$0xff] (%p3863_p2)  ;;  %v201_v1 = vld [vmem:[%s3847_s9] sm:$0xff] (%p3863_p2)  ;;  %s158_s27 = sfloor.f32 (%p3863_p2), %s3856_s8  ;;  %s160_s28 = sfloor.f32 (%p3863_p2), %s149_s13  ;;  %v167_v2 = vlaneseq (%p3863_p2)  ;;  %v204_v25 = vld [vmem:[%s3847_s9 + $0x18] sm:$0xff] (%p3863_p2)  ;;  %vm209_vm0 = vcmask (%p3863_p2), 130048  }
  0x54   : > { %156 = sbr.rel (!%p3863_p2) target bundleno = 617 (0x269), region = 32  ;;  %v3874_v3 = vand.u32 (%p3863_p2), 4294901760, %v202_v0  ;;  %v3876_v4 = vand.u32 (%p3863_p2), 4294901760, %v201_v1  ;;  %s161_s29 = ssub.f32 (%p3863_p2), %s160_s28, %s158_s27  ;;  %v178_v17 = vstv (%p3863_p2), %s158_s27  ;;  %v3915_v30 = vand.u32 (%p3863_p2), 4294901760, %v204_v25  ;;  %v203_v31 = vld [vmem:[%s3847_s9 + $0x10] sm:$0xff] (%p3863_p2)  ;;  %v206_v57 = vld [vmem:[%s3847_s9 + $0x28] sm:$0xff] (%p3863_p2) }
  0x55   : > { %v3878_v5 = vshrl.u32 (%p3863_p2), %v167_v2, 7  ;;  %v173_v9 = vand.u32 (%p3863_p2), 127, %v167_v2  ;;  %v3922_v37 = vand.u32 (%p3863_p2), 4294901760, %v203_v31  ;;  %v205_v58 = vld [vmem:[%s3847_s9 + $0x20] sm:$0xff] (%p3863_p2)  ;;  %v3988_v59 = vand.u32 (%p3863_p2), 4294901760, %v206_v57  ;;  %s157_s4 = sfloor.f32 (%p3863_p2), %s3854_s6  ;;  %s159_s7 = sfloor.f32 (%p3863_p2), %s3858_s11 }
  0x56   : > { %3298 = vmatprep.subr.mxu0 (%p3863_p2), %v3874_v3  ;;  %v3882_v6 = vsub.f32 (%p3863_p2), %v202_v0, %v3874_v3  ;;  %v3885_v7 = vsub.f32 (%p3863_p2), %v201_v1, %v3876_v4  ;;  %s3133_s3 = sadd.f32 (%p3863_p2), -1.0, %s161_s29  ;;  %v3920_v36 = vsub.f32 (%p3863_p2), %v204_v25, %v3915_v30  ;;  %v3992_v60 = vand.u32 (%p3863_p2), 4294901760, %v205_v58 }
  0x57   : > { %3299 = vmatpush3.msra.mxu0 (%p3863_p2), %v3874_v3  ;;  %v170_v8 = vcvt.s32.f32 (%p3863_p2), %v3878_v5  ;;  %v3890_v10 = vadd.s32 (%p3863_p2), 8, %v3878_v5  ;;  %v3906_v18 = vcvt.s32.f32 (%p3863_p2), %v173_v9  ;;  %v3934_v43 = vsub.f32 (%p3863_p2), %v203_v31, %v3922_v37  ;;  %s164_s8 = ssub.f32 (%p3863_p2), %s159_s7, %s157_s4 }
  0x58   : > { %v3893_v11 = vand.u32 (%p3863_p2), 4294901760, %v3882_v6  ;;  %3300 = vmatprep.subr.mxu0 (%p3863_p2), %v3876_v4  ;;  %v3897_v12 = vand.u32 (%p3863_p2), 4294901760, %v3885_v7  ;;  %s163_s5 = smul.f32 (%p3863_p2), 0.06666667, %s3133_s3  ;;  %v3931_v42 = vand.u32 (%p3863_p2), 4294901760, %v3920_v36  ;;  %v1337_v61 = vsub.f32 (%p3863_p2), %v206_v57, %v3988_v59 }
  0x59   : > { %3301 = vmatpush3.msra.mxu0 %v3876_v4  ;;  %v171_v13 = vcvt.s32.f32 %v3890_v10  ;;  %v3955_v49 = vand.u32 4294901760, %v3934_v43  ;;  %v1344_v62 = vsub.f32 %v205_v58, %v3992_v60  ;;  %s3134_s10 = sadd.f32 -1.0, %s164_s8 }
  0x5a   : > { %v335_v14 = vsub.f32 %v3882_v6, %v3893_v11  ;;  %v342_v15 = vsub.f32 %v3885_v7, %v3897_v12  ;;  %v175_v16 = vstv %s163_s5  ;;  %3312 = vmatprep.subr.mxu0 %v3882_v6  ;;  %v837_v48 = vsub.f32 %v3920_v36, %v3931_v42 }
  0x5b   : > { %v176_v19 = vmul.f32 %v175_v16, %v170_v8  ;;  %v177_v20 = vmul.f32 %v175_v16, %v171_v13  ;;  %v844_v55 = vsub.f32 %v3934_v43, %v3955_v49  ;;  %v1338_v63 = vand.u32 4294901760, %v1337_v61  ;;  %s166_s12 = smul.f32 0.06666667, %s3134_s10 }
  0x5c   : > { %v336_v21 = vand.u32 4294901760, %v335_v14  ;;  %v343_v22 = vand.u32 4294901760, %v342_v15  ;;  %v838_v54 = vand.u32 4294901760, %v837_v48  ;;  %v1345_v0 = vand.u32 4294901760, %v1344_v62 }
  0x5d   : > { %v179_v23 = vadd.f32 %v178_v17, %v176_v19  ;;  %v180_v24 = vadd.f32 %v178_v17, %v177_v20  ;;  %v845_v56 = vand.u32 4294901760, %v844_v55  ;;  %v1339_v1 = vsub.f32 %v1337_v61, %v1338_v63 }
  0x5e   : > { %3305 = vmatprep.subr.mxu1 %v336_v21  ;;  %v1346_v2 = vsub.f32 %v1344_v62, %v1345_v0 }
  0x5f   : > { %3306 = vmatpush3.msra.mxu1 %v336_v21  ;;  %v181_v26 = vsub.f32 %v179_v23, %v3906_v18  ;;  %v182_v27 = vsub.f32 %v180_v24, %v3906_v18  ;;  %v191_v24 = vstv %s157_s4 }
  0x60   : > { %3307 = vmatprep.subr.mxu1 %v343_v22 }
  0x61   : > { %v183_v28 = vand.u32 2147483647, %v181_v26  ;;  %3308 = vmatpush3.msra.mxu1 %v343_v22  ;;  %v184_v29 = vand.u32 2147483647, %v182_v27  ;;  %v189_v22 = vstv %s166_s12 }
  0x62   : > { %3319 = vmatprep.subr.mxu1 %v3874_v3  ;;  %v190_v23 = vmul.f32 %v189_v22, %v3906_v18 }
  0x63   : > { %v185_v32 = vsub.f32 1.0, %v183_v28  ;;  %v186_v33 = vsub.f32 1.0, %v184_v29 }
  0x64   : > { %v192_v25 = vadd.f32 %v191_v24, %v190_v23 }
  0x65   : > { %v187_v34 = vmax.f32 %v185_v32, 0.0  ;;  %v188_v35 = vmax.f32 %v186_v33, 0.0 }
  0x66   : > { %v194_v26 = vsub.f32 %v192_v25, %v171_v13  ;;  %v193_v28 = vsub.f32 %v192_v25, %v170_v8 }
  0x67   : > { %v211_v38 = vsel %vm209_vm0, %v187_v34, 0  ;;  %v214_v39 = vsel %vm209_vm0, %v188_v35, 0 }
  0x68   : > { %v3926_v40 = vand.u32 4294901760, %v211_v38  ;;  %v3928_v41 = vand.u32 4294901760, %v214_v39  ;;  %v196_v27 = vand.u32 2147483647, %v194_v26 }
  0x6a   : > { %v3937_v44 = vsub.f32 %v211_v38, %v3926_v40  ;;  %3309 = vmatprep.mubr.f32.mxu1 %v3926_v40  ;;  %v3941_v45 = vsub.f32 %v214_v39, %v3928_v41  ;;  %v198_v29 = vsub.f32 1.0, %v196_v27 }
  0x6b   : > { %3310 = vmatmul.mubr.f32.vlgmr.msra.gmra.mxu1 %v3928_v41 }
  0x6c   : > { %v3945_v46 = vand.u32 4294901760, %v3937_v44  ;;  %v3948_v47 = vand.u32 4294901760, %v3941_v45  ;;  %3320 = vmatpush3.msra.mxu1 %v3874_v3  ;;  %v200_v31 = vmax.f32 %v198_v29, 0.0 }
  0x6d   : > { %3321 = vmatprep.subr.mxu1 %v3876_v4 }
  0x6e   : > { %v286_v50 = vsub.f32 %v3937_v44, %v3945_v46  ;;  %v296_v51 = vsub.f32 %v3941_v45, %v3948_v47  ;;  %3322 = vmatpush3.msra.mxu1 %v3876_v4  ;;  %3323 = vmatprep.mubr.f32.mxu1 %v3945_v46  ;;  %v4092_v33 = vand.u32 4294901760, %v200_v31 }
  0x6f   : > { %3324 = vmatmul.mubr.f32.vlgmr.msra.gmra.mxu1 %v3948_v47  ;;  %3333 = vmatprep.subr.mxu1 %v3874_v3 }
  0x70   : > { %v3965_v52 = vand.u32 4294901760, %v286_v50  ;;  %v3967_v53 = vand.u32 4294901760, %v296_v51  ;;  %3334 = vmatpush3.msra.mxu1 %v3874_v3  ;;  %3337 = vmatprep.mubr.f32.mxu1 %v3926_v40  ;;  %v208_v3 = vld [vmem:[%s3847_s9 + $0x38] sm:$0xff]  ;;  %v4095_v35 = vsub.f32 %v200_v31, %v4092_v33 }
  0x71   : > { %3335 = vmatprep.subr.mxu1 %v3876_v4  ;;  %v4030_v9 = vand.u32 4294901760, %v208_v3 }
  0x72   : > { %3302 = vmatprep.mubr.f32.mxu0 %v3965_v52  ;;  %3336 = vmatpush3.msra.mxu1 %v3876_v4  ;;  %v1340_v4 = vand.u32 4294901760, %v1339_v1  ;;  %v4102_v10 = vand.u32 4294901760, %v4095_v35 }
  0x73   : > { %3303 = vmatmul.mubr.f32.vlgmr.msra.gmra.mxu0 %v3967_v53  ;;  %3338 = vmatmul.mubr.f32.vlgmr.msra.gmra.mxu1 %v3928_v41 }
  0x74   : > { %3313 = vmatpush3.msra.mxu0 %v3882_v6  ;;  %3316 = vmatprep.mubr.f32.mxu0 %v3937_v44  ;;  %v207_v6 = vld [vmem:[%s3847_s9 + $0x30] sm:$0xff]  ;;  %v2427_v8 = vsub.f32 %v4095_v35, %v4102_v10 }
  0x75   : > { %3314 = vmatprep.subr.mxu0 %v3885_v7  ;;  %3347 = vmatprep.subr.mxu1 %v838_v54 }
  0x76   : > { %3315 = vmatpush3.msra.mxu0 %v3885_v7  ;;  %3348 = vmatpush3.msra.mxu1 %v838_v54  ;;  %v1347_v7 = vand.u32 4294901760, %v1346_v2 }
  0x77   : > { %3326 = vmatprep.subr.mxu0 %v3893_v11  ;;  %3317 = vmatmul.mubr.f32.vlgmr.msra.gmra.mxu0 %v3941_v45 }
  0x78   : > { %3327 = vmatpush3.msra.mxu0 %v3893_v11  ;;  %3330 = vmatprep.mubr.f32.mxu0 %v3926_v40  ;;  %v4035_v11 = vand.u32 4294901760, %v207_v6 }
  0x79   : > { %3328 = vmatprep.subr.mxu0 %v3897_v12  ;;  %3349 = vmatprep.subr.mxu1 %v845_v56 }
  0x7a   : > { %3329 = vmatpush3.msra.mxu0 %v3897_v12  ;;  %3350 = vmatpush3.msra.mxu1 %v845_v56  ;;  %v1839_v12 = vsub.f32 %v208_v3, %v4030_v9  ;;  %v1846_v14 = vsub.f32 %v207_v6, %v4035_v11 }
  0x7b   : > { %3340 = vmatprep.subr.mxu0 %v3915_v30  ;;  %3331 = vmatmul.mubr.f32.vlgmr.msra.gmra.mxu0 %v3928_v41 }
  0x7c   : > { %3341 = vmatpush3.msra.mxu0 %v3915_v30  ;;  %3344 = vmatprep.mubr.f32.mxu0 %v3965_v52  ;;  %v1840_v15 = vand.u32 4294901760, %v1839_v12  ;;  %v1847_v16 = vand.u32 4294901760, %v1846_v14 }
  0x7d   : > { %3342 = vmatprep.subr.mxu0 %v3922_v37  ;;  %3351 = vmatprep.mubr.f32.mxu1 %v3926_v40 }
  0x7e   : > { %3343 = vmatpush3.msra.mxu0 %v3922_v37  ;;  %3352 = vmatmul.mubr.f32.vlgmr.msra.gmra.mxu1 %v3928_v41  ;;  %v1841_v17 = vsub.f32 %v1839_v12, %v1840_v15  ;;  %v1848_v19 = vsub.f32 %v1846_v14, %v1847_v16 }
  0x7f   : > { %3354 = vmatprep.subr.mxu0 %v3920_v36  ;;  %3345 = vmatmul.mubr.f32.vlgmr.msra.gmra.mxu0 %v3967_v53 }
  0x80   : > { %3355 = vmatpush3.msra.mxu0 %v3920_v36  ;;  %3361 = vmatprep.subr.mxu1 %v3915_v30  ;;  %v1842_v20 = vand.u32 4294901760, %v1841_v17  ;;  %v1849_v21 = vand.u32 4294901760, %v1848_v19  ;;  %v2428_v36 = vand.u32 4294901760, %v2427_v8 }
  0x81   : > { %3356 = vmatprep.subr.mxu0 %v3934_v43  ;;  %3362 = vmatpush3.msra.mxu1 %v3915_v30 }
  0x82   : > { %3357 = vmatpush3.msra.mxu0 %v3934_v43  ;;  %3363 = vmatprep.subr.mxu1 %v3922_v37 }
  0x83   : > { %3358 = vmatprep.mubr.f32.mxu0 %v3937_v44  ;;  %3364 = vmatpush3.msra.mxu1 %v3922_v37 }
  0x84   : > { %3365 = vmatprep.mubr.f32.mxu1 %v3945_v46  ;;  %3368 = vmatprep.subr.mxu0 %v3931_v42 }
  0x85   : > { %3359 = vmatmul.mubr.f32.vlgmr.msra.gmra.mxu0 %v3941_v45  ;;  %3366 = vmatmul.mubr.f32.vlgmr.msra.gmra.mxu1 %v3948_v47 }
  0x86   : > { %3369 = vmatpush3.msra.mxu0 %v3931_v42  ;;  %3375 = vmatprep.subr.mxu1 %v3915_v30 }
  0x87   : > { %3370 = vmatprep.subr.mxu0 %v3955_v49  ;;  %3376 = vmatpush3.msra.mxu1 %v3915_v30  ;;  %v195_v30 = vand.u32 2147483647, %v193_v28 }
  0x88   : > { %3371 = vmatpush3.msra.mxu0 %v3955_v49  ;;  %3377 = vmatprep.subr.mxu1 %v3922_v37 }
  0x89   : > { %3372 = vmatprep.mubr.f32.mxu0 %v3926_v40  ;;  %3378 = vmatpush3.msra.mxu1 %v3922_v37  ;;  %v197_v32 = vsub.f32 1.0, %v195_v30 }
  0x8a   : > { %3379 = vmatprep.mubr.f32.mxu1 %v3926_v40  ;;  %3382 = vmatprep.subr.mxu0 %v3988_v59 }
  0x8b   : > { %3373 = vmatmul.mubr.f32.vlgmr.msra.gmra.mxu0 %v3928_v41  ;;  %3380 = vmatmul.mubr.f32.vlgmr.msra.gmra.mxu1 %v3928_v41  ;;  %v199_v34 = vmax.f32 %v197_v32, 0.0 }
  0x8c   : > { %3383 = vmatpush3.msra.mxu0 %v3988_v59  ;;  %3389 = vmatprep.subr.mxu1 %v1340_v4 }
  0x8d   : > { %3384 = vmatprep.subr.mxu0 %v3992_v60  ;;  %3390 = vmatpush3.msra.mxu1 %v1340_v4  ;;  %v4097_v18 = vand.u32 4294901760, %v199_v34 }
  0x8e   : > { %3385 = vmatpush3.msra.mxu0 %v3992_v60  ;;  %3391 = vmatprep.subr.mxu1 %v1347_v7 }
  0x8f   : > { %3386 = vmatprep.mubr.f32.mxu0 %v3965_v52  ;;  %3392 = vmatpush3.msra.mxu1 %v1347_v7  ;;  %v4105_v5 = vsub.f32 %v199_v34, %v4097_v18 }
  0x90   : > { %3393 = vmatprep.mubr.f32.mxu1 %v3926_v40  ;;  %3396 = vmatprep.subr.mxu0 %v1337_v61 }
  0x91   : > { %3387 = vmatmul.mubr.f32.vlgmr.msra.gmra.mxu0 %v3967_v53  ;;  %3394 = vmatmul.mubr.f32.vlgmr.msra.gmra.mxu1 %v3928_v41  ;;  %v4112_v13 = vand.u32 4294901760, %v4105_v5 }
  0x92   : > { %3397 = vmatpush3.msra.mxu0 %v1337_v61  ;;  %3403 = vmatprep.subr.mxu1 %v3988_v59 }
  0x93   : > { %3398 = vmatprep.subr.mxu0 %v1344_v62  ;;  %3404 = vmatpush3.msra.mxu1 %v3988_v59  ;;  %v2434_v37 = vsub.f32 %v4105_v5, %v4112_v13 }
  0x94   : > { %3399 = vmatpush3.msra.mxu0 %v1344_v62  ;;  %3405 = vmatprep.subr.mxu1 %v3992_v60 }
  0x95   : > { %3400 = vmatprep.mubr.f32.mxu0 %v3937_v44  ;;  %3406 = vmatpush3.msra.mxu1 %v3992_v60  ;;  %v2435_v38 = vand.u32 4294901760, %v2434_v37 }
  0x96   : > { %3407 = vmatprep.mubr.f32.mxu1 %v3945_v46  ;;  %3410 = vmatprep.subr.mxu0 %v1338_v63 }
  0x97   : > { %3401 = vmatmul.mubr.f32.vlgmr.msra.gmra.mxu0 %v3941_v45  ;;  %3408 = vmatmul.mubr.f32.vlgmr.msra.gmra.mxu1 %v3948_v47 }
  0x98   : > { %3411 = vmatpush3.msra.mxu0 %v1338_v63  ;;  %3417 = vmatprep.subr.mxu1 %v3988_v59 }
  0x99   : > { %3412 = vmatprep.subr.mxu0 %v1345_v0  ;;  %3418 = vmatpush3.msra.mxu1 %v3988_v59 }
  0x9a   : > { %3413 = vmatpush3.msra.mxu0 %v1345_v0  ;;  %3419 = vmatprep.subr.mxu1 %v3992_v60 }
  0x9b   : > { %3414 = vmatprep.mubr.f32.mxu0 %v3926_v40  ;;  %3420 = vmatpush3.msra.mxu1 %v3992_v60 }
  0x9c   : > { %3421 = vmatprep.mubr.f32.mxu1 %v3926_v40  ;;  %3424 = vmatprep.subr.mxu0 %v4030_v9 }
  0x9d   : > { %3415 = vmatmul.mubr.f32.vlgmr.msra.gmra.mxu0 %v3928_v41  ;;  %3422 = vmatmul.mubr.f32.vlgmr.msra.gmra.mxu1 %v3928_v41 }
  0x9e   : > { %3425 = vmatpush3.msra.mxu0 %v4030_v9  ;;  %3431 = vmatprep.subr.mxu1 %v1842_v20 }
  0x9f   : > { %3426 = vmatprep.subr.mxu0 %v4035_v11  ;;  %3432 = vmatpush3.msra.mxu1 %v1842_v20 }
  0xa0   : > { %3427 = vmatpush3.msra.mxu0 %v4035_v11  ;;  %3433 = vmatprep.subr.mxu1 %v1849_v21 }
  0xa1   : > { %3428 = vmatprep.mubr.f32.mxu0 %v3965_v52  ;;  %3434 = vmatpush3.msra.mxu1 %v1849_v21 }
  0xa2   : > { %3435 = vmatprep.mubr.f32.mxu1 %v3926_v40  ;;  %3438 = vmatprep.subr.mxu0 %v1839_v12 }
  0xa3   : > { %3429 = vmatmul.mubr.f32.vlgmr.msra.gmra.mxu0 %v3967_v53  ;;  %3436 = vmatmul.mubr.f32.vlgmr.msra.gmra.mxu1 %v3928_v41 }
  0xa4   : > { %3439 = vmatpush3.msra.mxu0 %v1839_v12  ;;  %3445 = vmatprep.subr.mxu1 %v4030_v9 }
  0xa5   : > { %3440 = vmatprep.subr.mxu0 %v1846_v14  ;;  %3446 = vmatpush3.msra.mxu1 %v4030_v9 }
  0xa6   : > { %3441 = vmatpush3.msra.mxu0 %v1846_v14  ;;  %3447 = vmatprep.subr.mxu1 %v4035_v11 }
  0xa7   : > { %3442 = vmatprep.mubr.f32.mxu0 %v3937_v44  ;;  %3448 = vmatpush3.msra.mxu1 %v4035_v11 }
  0xa8   : > { %3449 = vmatprep.mubr.f32.mxu1 %v3945_v46  ;;  %3452 = vmatprep.subr.mxu0 %v1840_v15 }
  0xa9   : > { %3443 = vmatmul.mubr.f32.vlgmr.msra.gmra.mxu0 %v3941_v45  ;;  %3450 = vmatmul.mubr.f32.vlgmr.msra.gmra.mxu1 %v3948_v47 }
  0xaa   : > { %3453 = vmatpush3.msra.mxu0 %v1840_v15  ;;  %3459 = vmatprep.subr.mxu1 %v4030_v9 }
  0xab   : > { %3454 = vmatprep.subr.mxu0 %v1847_v16  ;;  %3460 = vmatpush3.msra.mxu1 %v4030_v9 }
  0xac   : > { %3455 = vmatpush3.msra.mxu0 %v1847_v16  ;;  %3461 = vmatprep.subr.mxu1 %v4035_v11 }
  0xad   : > { %3456 = vmatprep.mubr.f32.mxu0 %v3926_v40  ;;  %3462 = vmatpush3.msra.mxu1 %v4035_v11 }
  0xae   : > { %3463 = vmatprep.mubr.f32.mxu1 %v3926_v40  ;;  %3457 = vmatmul.mubr.f32.vlgmr.msra.gmra.mxu0 %v3928_v41 }
  0xaf   : > { %3464 = vmatmul.mubr.f32.vlgmr.msra.gmra.mxu1 %v3928_v41  ;;  %3466 = vmatprep.subr.mxu0 %v4092_v33 }
  0xb0   : > { %3467 = vmatpush3.msra.mxu0 %v4092_v33  ;;  %3482 = vmatprep.subr.mxu1 %v2428_v36 }
  0xb1   : > { %3468 = vmatprep.subr.mxu0 %v4097_v18  ;;  %3483 = vmatpush3.msra.mxu1 %v2428_v36 }
  0xb2   : > { %3469 = vmatpush3.msra.mxu0 %v4097_v18  ;;  %3484 = vmatprep.subr.mxu1 %v2435_v38 }
  0xb3   : > { %3498 = vmatprep.subr.mxu0 %v4095_v35  ;;  %3485 = vmatpush3.msra.mxu1 %v2435_v38 }
  0xb4   : > { %3514 = vmatprep.subr.mxu1 %v4092_v33 }
 0x12b   : > { %v3311_v39 = vpop.f32.mrf.mxu1 }
 0x12d   : > { %v380_v40 = vpop.f32.mrf.mxu1 }
 0x12f   : > { %v3325_v41 = vpop.f32.mrf.mxu1 }
 0x131   : > { %v544_v42 = vpop.f32.mrf.mxu1 }
 0x133   : > { %v3304_v43 = vpop.f32.mrf.mxu0  ;;  %v3339_v46 = vpop.f32.mrf.mxu1 }
 0x134   : > { %v387_v45 = vadd.f32 %v3311_v39, %v3304_v43 }
 0x135   : > { %v289_v44 = vpop.f32.mrf.mxu0  ;;  %v708_v53 = vpop.f32.mrf.mxu1 }
 0x136   : > { %v381_v48 = vadd.f32 %v380_v40, %v289_v44 }
 0x137   : > { %v3318_v47 = vpop.f32.mrf.mxu0 }
 0x138   : > { %v470_v49 = vadd.f32 %v3318_v47, %v387_v45 }
 0x139   : > { %v462_v50 = vpop.f32.mrf.mxu0 }
 0x13a   : > { %v553_v51 = vadd.f32 %v3325_v41, %v470_v49  ;;  %v463_v52 = vadd.f32 %v462_v50, %v381_v48 }
 0x13b   : > { %v3332_v54 = vpop.f32.mrf.mxu0 }
 0x13c   : > { %v545_v55 = vadd.f32 %v544_v42, %v463_v52  ;;  %v636_v56 = vadd.f32 %v3332_v54, %v553_v51 }
 0x13d   : > { %v629_v57 = vpop.f32.mrf.mxu0 }
 0x13e   : > { %v715_v58 = vadd.f32 %v3339_v46, %v636_v56  ;;  %v630_v59 = vadd.f32 %v629_v57, %v545_v55  ;;  %v3353_v60 = vpop.f32.mrf.mxu1 }
 0x13f   : > { %v3346_v61 = vpop.f32.mrf.mxu0 }
 0x140   : > { %v2228_v62 = vsel %vm209_vm0, %v715_v58, 0  ;;  %v709_v63 = vadd.f32 %v708_v53, %v630_v59  ;;  %v882_v2 = vpop.f32.mrf.mxu1  ;;  %v889_v7 = vadd.f32 %v3353_v60, %v3346_v61 }
 0x141   : > { %v4119_v0 = vand.u32 4294901760, %v2228_v62  ;;  %v791_v1 = vpop.f32.mrf.mxu0 }
 0x142   : > { %v2225_v3 = vsel %vm209_vm0, %v709_v63, 0  ;;  %v883_v15 = vadd.f32 %v882_v2, %v791_v1 }
 0x143   : > { %v4123_v4 = vsub.f32 %v2228_v62, %v4119_v0  ;;  %v4125_v6 = vand.u32 4294901760, %v2225_v3 }
 0x145   : > { %v2327_v9 = vand.u32 4294901760, %v4123_v4  ;;  %v4129_v11 = vsub.f32 %v2225_v3, %v4125_v6  ;;  %v3360_v12 = vpop.f32.mrf.mxu0  ;;  %v3367_v14 = vpop.f32.mrf.mxu1  ;;  %3486 = vmatprep.mubr.f32.mxu1 %v4125_v6 }
 0x146   : > { %v972_v16 = vadd.f32 %v3360_v12, %v889_v7  ;;  %3487 = vmatmul.mubr.f32.vlgmr.msra.gmra.mxu1 %v4119_v0 }
 0x147   : > { %v964_v17 = vpop.f32.mrf.mxu0  ;;  %v1046_v19 = vpop.f32.mrf.mxu1  ;;  %v2317_v20 = vand.u32 4294901760, %v4129_v11  ;;  %3515 = vmatpush3.msra.mxu1 %v4092_v33  ;;  %v2328_v23 = vsub.f32 %v4123_v4, %v2327_v9 }
 0x148   : > { %v1055_v21 = vadd.f32 %v3367_v14, %v972_v16  ;;  %v965_v22 = vadd.f32 %v964_v17, %v883_v15  ;;  %3516 = vmatprep.subr.mxu1 %v4097_v18 }
 0x149   : > { %v2318_v24 = vsub.f32 %v4129_v11, %v2317_v20  ;;  %3517 = vmatpush3.msra.mxu1 %v4097_v18  ;;  %v2329_v30 = vand.u32 4294901760, %v2328_v23 }
 0x14a   : > { %v1047_v25 = vadd.f32 %v1046_v19, %v965_v22  ;;  %3546 = vmatprep.subr.mxu1 %v4092_v33 }
 0x14b   : > { %v3374_v26 = vpop.f32.mrf.mxu0  ;;  %v3381_v27 = vpop.f32.mrf.mxu1  ;;  %v2319_v28 = vand.u32 4294901760, %v2318_v24 }
 0x14c   : > { %v1138_v29 = vadd.f32 %v3374_v26, %v1055_v21 }
 0x14d   : > { %v1131_v31 = vpop.f32.mrf.mxu0  ;;  %v1210_v32 = vpop.f32.mrf.mxu1  ;;  %3470 = vmatprep.mubr.f32.mxu0 %v2319_v28 }
 0x14e   : > { %v1217_v34 = vadd.f32 %v3381_v27, %v1138_v29  ;;  %v1132_v8 = vadd.f32 %v1131_v31, %v1047_v25  ;;  %3471 = vmatmul.mubr.f32.vlgmr.msra.gmra.mxu0 %v2329_v30 }
 0x14f   : > { %3499 = vmatpush3.msra.mxu0 %v4095_v35 }
 0x150   : > { %v2234_v36 = vsel %vm209_vm0, %v1217_v34, 0  ;;  %v1211_v37 = vadd.f32 %v1210_v32, %v1132_v8  ;;  %3500 = vmatprep.subr.mxu0 %v4105_v5 }
 0x151   : > { %v4147_v38 = vand.u32 4294901760, %v2234_v36  ;;  %v3388_v39 = vpop.f32.mrf.mxu0  ;;  %v3395_v40 = vpop.f32.mrf.mxu1  ;;  %3501 = vmatpush3.msra.mxu0 %v4105_v5 }
 0x152   : > { %v2231_v41 = vsel %vm209_vm0, %v1211_v37, 0  ;;  %3530 = vmatprep.subr.mxu0 %v4102_v10  ;;  %v1391_v47 = vadd.f32 %v3395_v40, %v3388_v39 }
 0x153   : > { %v4153_v42 = vsub.f32 %v2234_v36, %v4147_v38  ;;  %v4155_v43 = vand.u32 4294901760, %v2231_v41  ;;  %v1293_v35 = vpop.f32.mrf.mxu0  ;;  %v1384_v44 = vpop.f32.mrf.mxu1 }
 0x154   : > { %v1385_v50 = vadd.f32 %v1384_v44, %v1293_v35 }
 0x155   : > { %v4158_v45 = vsub.f32 %v2231_v41, %v4155_v43  ;;  %3489 = vmatprep.mubr.f32.mxu1 %v4155_v43  ;;  %v2347_v46 = vand.u32 4294901760, %v4153_v42 }
 0x156   : > { %3490 = vmatmul.mubr.f32.gmra.mxu1 %v4147_v38 }
 0x157   : > { %v3402_v5 = vpop.f32.mrf.mxu0  ;;  %v3409_v48 = vpop.f32.mrf.mxu1  ;;  %v2337_v49 = vand.u32 4294901760, %v4158_v45  ;;  %v2348_v52 = vsub.f32 %v4153_v42, %v2347_v46 }
 0x158   : > { %v1474_v51 = vadd.f32 %v3402_v5, %v1391_v47 }
 0x159   : > { %v1466_v53 = vpop.f32.mrf.mxu0  ;;  %v1548_v54 = vpop.f32.mrf.mxu1  ;;  %v2338_v55 = vsub.f32 %v4158_v45, %v2337_v49  ;;  %v2349_v60 = vand.u32 4294901760, %v2348_v52 }
 0x15a   : > { %v1557_v56 = vadd.f32 %v3409_v48, %v1474_v51  ;;  %v1467_v57 = vadd.f32 %v1466_v53, %v1385_v50 }
 0x15b   : > { %v2339_v58 = vand.u32 4294901760, %v2338_v55 }
 0x15c   : > { %v1549_v59 = vadd.f32 %v1548_v54, %v1467_v57 }
 0x15d   : > { %v3416_v61 = vpop.f32.mrf.mxu0  ;;  %v3423_v62 = vpop.f32.mrf.mxu1  ;;  %3473 = vmatprep.mubr.f32.mxu0 %v2339_v58 }
 0x15e   : > { %v1640_v63 = vadd.f32 %v3416_v61, %v1557_v56  ;;  %3474 = vmatmul.mubr.f32.gmra.mxu0 %v2349_v60 }
 0x15f   : > { %v1633_v1 = vpop.f32.mrf.mxu0  ;;  %v1712_v2 = vpop.f32.mrf.mxu1 }
 0x160   : > { %v1719_v3 = vadd.f32 %v3423_v62, %v1640_v63  ;;  %v1634_v7 = vadd.f32 %v1633_v1, %v1549_v59 }
 0x162   : > { %v2240_v12 = vsel %vm209_vm0, %v1719_v3, 0  ;;  %v1713_v14 = vadd.f32 %v1712_v2, %v1634_v7 }
 0x163   : > { %v4171_v15 = vand.u32 4294901760, %v2240_v12  ;;  %v3430_v16 = vpop.f32.mrf.mxu0  ;;  %v3437_v17 = vpop.f32.mrf.mxu1 }
 0x164   : > { %v2237_v19 = vsel %vm209_vm0, %v1713_v14, 0  ;;  %v1893_v27 = vadd.f32 %v3437_v17, %v3430_v16 }
 0x165   : > { %v4175_v21 = vsub.f32 %v2240_v12, %v4171_v15  ;;  %v4177_v22 = vand.u32 4294901760, %v2237_v19  ;;  %v1795_v23 = vpop.f32.mrf.mxu0  ;;  %v1886_v24 = vpop.f32.mrf.mxu1 }
 0x166   : > { %v1887_v31 = vadd.f32 %v1886_v24, %v1795_v23 }
 0x167   : > { %v2356_v25 = vsub.f32 %v2237_v19, %v4177_v22  ;;  %3492 = vmatprep.mubr.f32.mxu1 %v4177_v22  ;;  %v2367_v26 = vand.u32 4294901760, %v4175_v21 }
 0x168   : > { %3493 = vmatmul.mubr.f32.gmra.mxu1 %v4171_v15 }
 0x169   : > { %v3444_v28 = vpop.f32.mrf.mxu0  ;;  %v3451_v29 = vpop.f32.mrf.mxu1  ;;  %v2357_v30 = vand.u32 4294901760, %v2356_v25  ;;  %v2368_v34 = vsub.f32 %v4175_v21, %v2367_v26 }
 0x16a   : > { %v1976_v32 = vadd.f32 %v3444_v28, %v1893_v27 }
 0x16b   : > { %v1968_v8 = vpop.f32.mrf.mxu0  ;;  %v2050_v36 = vpop.f32.mrf.mxu1  ;;  %v2358_v37 = vsub.f32 %v2356_v25, %v2357_v30  ;;  %v2369_v47 = vand.u32 4294901760, %v2368_v34 }
 0x16c   : > { %v2059_v39 = vadd.f32 %v3451_v29, %v1976_v32  ;;  %v1969_v40 = vadd.f32 %v1968_v8, %v1887_v31 }
 0x16d   : > { %v2359_v41 = vand.u32 4294901760, %v2358_v37 }
 0x16e   : > { %v2051_v35 = vadd.f32 %v2050_v36, %v1969_v40  ;;  %v3458_v44 = vpop.f32.mrf.mxu0 }
 0x16f   : > { %v2142_v5 = vadd.f32 %v3458_v44, %v2059_v39  ;;  %v3465_v48 = vpop.f32.mrf.mxu1  ;;  %3476 = vmatprep.mubr.f32.mxu0 %v2359_v41 }
 0x170   : > { %v2135_v50 = vpop.f32.mrf.mxu0  ;;  %3477 = vmatmul.mubr.f32.gmra.mxu0 %v2369_v47 }
 0x171   : > { %v2221_v51 = vadd.f32 %v3465_v48, %v2142_v5  ;;  %v2136_v52 = vadd.f32 %v2135_v50, %v2051_v35  ;;  %v2214_v53 = vpop.f32.mrf.mxu1 }
 0x173   : > { %v2246_v54 = vsel %vm209_vm0, %v2221_v51, 0  ;;  %v2215_v55 = vadd.f32 %v2214_v53, %v2136_v52 }
 0x174   : > { %v2385_v56 = vand.u32 4294901760, %v2246_v54 }
 0x175   : > { %v2243_v57 = vsel %vm209_vm0, %v2215_v55, 0 }
 0x176   : > { %v2386_v58 = vsub.f32 %v2246_v54, %v2385_v56  ;;  %v2375_v59 = vand.u32 4294901760, %v2243_v57 }
 0x178   : > { %v2376_v60 = vsub.f32 %v2243_v57, %v2375_v59  ;;  %3495 = vmatprep.mubr.f32.mxu1 %v2375_v59  ;;  %v2387_v61 = vand.u32 4294901760, %v2386_v58 }
 0x179   : > { %3496 = vmatmul.mubr.f32.gmra.mxu1 %v2385_v56 }
 0x17a   : > { %3518 = vmatprep.mubr.f32.mxu1 %v2317_v20  ;;  %v2377_v62 = vand.u32 4294901760, %v2376_v60  ;;  %v2388_v63 = vsub.f32 %v2386_v58, %v2387_v61 }
 0x17c   : > { %v2378_v1 = vsub.f32 %v2376_v60, %v2377_v62  ;;  %v2389_v3 = vand.u32 4294901760, %v2388_v63 }
 0x17d   : > { %3519 = vmatmul.mubr.f32.vlgmr.msra.gmra.mxu1 %v2327_v9 }
 0x17e   : > { %3521 = vmatprep.mubr.f32.mxu1 %v2337_v49  ;;  %v2379_v2 = vand.u32 4294901760, %v2378_v1  ;;  %3547 = vmatpush3.msra.mxu1 %v4092_v33 }
 0x17f   : > { %3548 = vmatprep.subr.mxu1 %v4097_v18 }
 0x180   : > { %3479 = vmatprep.mubr.f32.mxu0 %v2379_v2  ;;  %3549 = vmatpush3.msra.mxu1 %v4097_v18 }
 0x181   : > { %3480 = vmatmul.mubr.f32.gmra.mxu0 %v2389_v3  ;;  %3522 = vmatmul.mubr.f32.gmra.mxu1 %v2347_v46 }
 0x182   : > { %3502 = vmatprep.mubr.f32.mxu0 %v4129_v11  ;;  %3524 = vmatprep.mubr.f32.mxu1 %v2357_v30 }
 0x185   : > { %3503 = vmatmul.mubr.f32.vlgmr.msra.gmra.mxu0 %v4123_v4  ;;  %3525 = vmatmul.mubr.f32.gmra.mxu1 %v2367_v26 }
 0x186   : > { %3531 = vmatpush3.msra.mxu0 %v4102_v10  ;;  %3505 = vmatprep.mubr.f32.mxu0 %v4158_v45 }
 0x187   : > { %3527 = vmatprep.mubr.f32.mxu1 %v2377_v62  ;;  %3532 = vmatprep.subr.mxu0 %v4112_v13 }
 0x188   : > { %3533 = vmatpush3.msra.mxu0 %v4112_v13 }
 0x189   : > { %3506 = vmatmul.mubr.f32.gmra.mxu0 %v4153_v42  ;;  %3528 = vmatmul.mubr.f32.gmra.mxu1 %v2387_v61 }
 0x18a   : > { %3508 = vmatprep.mubr.f32.mxu0 %v2356_v25  ;;  %3550 = vmatprep.mubr.f32.mxu1 %v4125_v6 }
 0x18d   : > { %3509 = vmatmul.mubr.f32.gmra.mxu0 %v4175_v21  ;;  %3551 = vmatmul.mubr.f32.vlgmr.msra.gmra.mxu1 %v4119_v0 }
 0x18e   : > { %3511 = vmatprep.mubr.f32.mxu0 %v2376_v60  ;;  %3553 = vmatprep.mubr.f32.mxu1 %v4155_v43 }
 0x191   : > { %3512 = vmatmul.mubr.f32.gmra.mxu0 %v2386_v58  ;;  %3554 = vmatmul.mubr.f32.gmra.mxu1 %v4147_v38 }
 0x192   : > { %3534 = vmatprep.mubr.f32.mxu0 %v4125_v6  ;;  %3556 = vmatprep.mubr.f32.mxu1 %v4177_v22 }
 0x195   : > { %3535 = vmatmul.mubr.f32.vlgmr.msra.gmra.mxu0 %v4119_v0  ;;  %3557 = vmatmul.mubr.f32.gmra.mxu1 %v4171_v15 }
 0x196   : > { %3537 = vmatprep.mubr.f32.mxu0 %v4155_v43  ;;  %3559 = vmatprep.mubr.f32.mxu1 %v2375_v59 }
 0x199   : > { %3538 = vmatmul.mubr.f32.gmra.mxu0 %v4147_v38  ;;  %3560 = vmatmul.mubr.f32.gmra.mxu1 %v2385_v56 }
 0x19a   : > { %3540 = vmatprep.mubr.f32.mxu0 %v4177_v22 }
 0x19d   : > { %3541 = vmatmul.mubr.f32.gmra.mxu0 %v4171_v15 }
 0x19e   : > { %3543 = vmatprep.mubr.f32.mxu0 %v2375_v59 }
 0x1a1   : > { %3544 = vmatmul.mubr.f32.gmra.mxu0 %v2385_v56 }
 0x206   : > { %v3488_v33 = vpop.f32.mrf.mxu1 }
 0x208   : > { %v2472_v18 = vpop.f32.mrf.mxu1 }
 0x20e   : > { %v3472_v13 = vpop.f32.mrf.mxu0 }
 0x20f   : > { %v2479_v28 = vadd.f32 %v3488_v33, %v3472_v13 }
 0x210   : > { %v2321_v0 = vpop.f32.mrf.mxu0 }
 0x211   : > { %v2473_v31 = vadd.f32 %v2472_v18, %v2321_v0 }
 0x216   : > { %v3491_v10 = vpop.f32.mrf.mxu1 }
 0x218   : > { %v2484_v4 = vpop.f32.mrf.mxu1 }
 0x21e   : > { %v3475_v9 = vpop.f32.mrf.mxu0 }
 0x21f   : > { %v2491_v36 = vadd.f32 %v3491_v10, %v3475_v9 }
 0x220   : > { %v2341_v20 = vpop.f32.mrf.mxu0 }
 0x221   : > { %v2485_v40 = vadd.f32 %v2484_v4, %v2341_v20 }
 0x228   : > { %v3494_v6 = vpop.f32.mrf.mxu1 }
 0x22a   : > { %v2496_v11 = vpop.f32.mrf.mxu1 }
 0x230   : > { %v3478_v43 = vpop.f32.mrf.mxu0 }
 0x231   : > { %v2503_v5 = vadd.f32 %v3494_v6, %v3478_v43 }
 0x232   : > { %v2361_v46 = vpop.f32.mrf.mxu0 }
 0x233   : > { %v2497_v52 = vadd.f32 %v2496_v11, %v2361_v46 }
 0x239   : > { %v3497_v42 = vpop.f32.mrf.mxu1 }
 0x23b   : > { %v2508_v38 = vpop.f32.mrf.mxu1 }
 0x23d   : > { %v3520_v45 = vpop.f32.mrf.mxu1 }
 0x23f   : > { %v2714_v49 = vpop.f32.mrf.mxu1 }
 0x241   : > { %v3481_v7 = vpop.f32.mrf.mxu0  ;;  %v3523_v12 = vpop.f32.mrf.mxu1 }
 0x242   : > { %v2515_v58 = vadd.f32 %v3497_v42, %v3481_v7 }
 0x243   : > { %v2381_v14 = vpop.f32.mrf.mxu0  ;;  %v2730_v15 = vpop.f32.mrf.mxu1 }
 0x244   : > { %v2509_v2 = vadd.f32 %v2508_v38, %v2381_v14 }
 0x245   : > { %v3504_v16 = vpop.f32.mrf.mxu0  ;;  %v3526_v17 = vpop.f32.mrf.mxu1 }
 0x246   : > { %v2598_v32 = vadd.f32 %v3504_v16, %v2479_v28 }
 0x247   : > { %v2590_v19 = vpop.f32.mrf.mxu0  ;;  %v2746_v21 = vpop.f32.mrf.mxu1 }
 0x248   : > { %v2591_v37 = vadd.f32 %v2590_v19, %v2473_v31  ;;  %v2723_v35 = vadd.f32 %v3520_v45, %v2598_v32 }
 0x249   : > { %v3507_v22 = vpop.f32.mrf.mxu0  ;;  %v3529_v23 = vpop.f32.mrf.mxu1 }
 0x24a   : > { %v2612_v41 = vadd.f32 %v3507_v22, %v2491_v36  ;;  %v2715_v51 = vadd.f32 %v2714_v49, %v2591_v37 }
 0x24b   : > { %v2604_v24 = vpop.f32.mrf.mxu0  ;;  %v2762_v25 = vpop.f32.mrf.mxu1 }
 0x24c   : > { %v2605_v48 = vadd.f32 %v2604_v24, %v2485_v40  ;;  %v2739_v57 = vadd.f32 %v3523_v12, %v2612_v41 }
 0x24d   : > { %v3510_v26 = vpop.f32.mrf.mxu0  ;;  %v3552_v27 = vpop.f32.mrf.mxu1 }
 0x24e   : > { %v2626_v54 = vadd.f32 %v3510_v26, %v2503_v5  ;;  %v2731_v1 = vadd.f32 %v2730_v15, %v2605_v48 }
 0x24f   : > { %v2618_v29 = vpop.f32.mrf.mxu0  ;;  %v2962_v30 = vpop.f32.mrf.mxu1 }
 0x250   : > { %v2619_v61 = vadd.f32 %v2618_v29, %v2497_v52  ;;  %v2755_v13 = vadd.f32 %v3526_v17, %v2626_v54 }
 0x251   : > { %v3513_v34 = vpop.f32.mrf.mxu0  ;;  %v3555_v8 = vpop.f32.mrf.mxu1 }
 0x252   : > { %v2640_v33 = vadd.f32 %v3513_v34, %v2515_v58  ;;  %v2747_v20 = vadd.f32 %v2746_v21, %v2619_v61 }
 0x253   : > { %v2632_v39 = vpop.f32.mrf.mxu0  ;;  %v2974_v44 = vpop.f32.mrf.mxu1 }
 0x254   : > { %v2633_v6 = vadd.f32 %v2632_v39, %v2509_v2  ;;  %v2771_v45 = vadd.f32 %v3529_v23, %v2640_v33 }
 0x255   : > { %v3536_v47 = vpop.f32.mrf.mxu0  ;;  %v3558_v59 = vpop.f32.mrf.mxu1 }
 0x256   : > { %v2854_v50 = vadd.f32 %v3536_v47, %v2723_v35  ;;  %v2763_v14 = vadd.f32 %v2762_v25, %v2633_v6 }
 0x257   : > { %v2847_v53 = vpop.f32.mrf.mxu0  ;;  %v2986_v4 = vpop.f32.mrf.mxu1 }
 0x258   : > { %v2969_v55 = vadd.f32 %v3552_v27, %v2854_v50  ;;  %v2848_v56 = vadd.f32 %v2847_v53, %v2715_v51 }
 0x259   : > { %v3539_v60 = vpop.f32.mrf.mxu0  ;;  %v3561_v46 = vpop.f32.mrf.mxu1 }
 0x25a   : > { %3009 = vst.msk [vmem:[%s3867_s23 + $0x8] sm:$0xff] %vm209_vm0, %v2969_v55  ;;  %v2963_v62 = vadd.f32 %v2962_v30, %v2848_v56  ;;  %v2866_v63 = vadd.f32 %v3539_v60, %v2739_v57 }
 0x25b   : > { %v2859_v3 = vpop.f32.mrf.mxu0  ;;  %v2998_v19 = vpop.f32.mrf.mxu1 }
 0x25c   : > { %3008 = vst.msk [vmem:[%s3867_s23] sm:$0xff] %vm209_vm0, %v2963_v62  ;;  %v2981_v18 = vadd.f32 %v3555_v8, %v2866_v63  ;;  %v2860_v10 = vadd.f32 %v2859_v3, %v2731_v1 }
 0x25d   : > { %v3542_v0 = vpop.f32.mrf.mxu0 }
 0x25e   : > { %3011 = vst.msk [vmem:[%s3867_s23 + $0x18] sm:$0xff] %vm209_vm0, %v2981_v18  ;;  %v2975_v9 = vadd.f32 %v2974_v44, %v2860_v10  ;;  %v2878_v11 = vadd.f32 %v3542_v0, %v2755_v13 }
 0x25f   : > { %v2871_v42 = vpop.f32.mrf.mxu0 }
 0x260   : > { %3010 = vst.msk [vmem:[%s3867_s23 + $0x10] sm:$0xff] %vm209_vm0, %v2975_v9  ;;  %v2993_v43 = vadd.f32 %v3558_v59, %v2878_v11  ;;  %v2872_v38 = vadd.f32 %v2871_v42, %v2747_v20 }
 0x261   : > { %v3545_v49 = vpop.f32.mrf.mxu0 }
 0x262   : > { %3013 = vst.msk [vmem:[%s3867_s23 + $0x28] sm:$0xff] %vm209_vm0, %v2993_v43  ;;  %v2987_v7 = vadd.f32 %v2986_v4, %v2872_v38  ;;  %v2890_v12 = vadd.f32 %v3545_v49, %v2771_v45 }
 0x263   : > { %v2883_v15 = vpop.f32.mrf.mxu0 }
 0x264   : > { %3012 = vst.msk [vmem:[%s3867_s23 + $0x20] sm:$0xff] %vm209_vm0, %v2987_v7  ;;  %v3005_v16 = vadd.f32 %v3561_v46, %v2890_v12  ;;  %v2884_v17 = vadd.f32 %v2883_v15, %v2763_v14 }
 0x266   : > { %3015 = vst.msk [vmem:[%s3867_s23 + $0x38] sm:$0xff] %vm209_vm0, %v3005_v16  ;;  %v2999_v21 = vadd.f32 %v2998_v19, %v2884_v17 }
 0x268   : > { %3014 = vst.msk [vmem:[%s3867_s23 + $0x30] sm:$0xff] %vm209_vm0, %v2999_v21 }
 0x269 PF: > { %3018 = sbr.rel (%p3863_p2) target bundleno = 627 (0x273), region = 36 }
 0x26e   : > { %v3019_v22 = vld [vmem:[%s3847_s9] sm:$0xff]  ;;  %vm3027_vm1 = vcmask 130048   ;;  %v3020_v23 = vld [vmem:[%s3847_s9 + $0x8] sm:$0xff]  ;;  %v3021_v24 = vld [vmem:[%s3847_s9 + $0x10] sm:$0xff] }
 0x26f   : > { %3028 = vst.msk [vmem:[%s3867_s23] sm:$0xff] %vm3027_vm1, %v3019_v22  ;;  %3029 = vst.msk [vmem:[%s3867_s23 + $0x8] sm:$0xff] %vm3027_vm1, %v3020_v23  ;;  %v3022_v25 = vld [vmem:[%s3847_s9 + $0x18] sm:$0xff]  ;;  %v3023_v26 = vld [vmem:[%s3847_s9 + $0x20] sm:$0xff] }
 0x270   : > { %3030 = vst.msk [vmem:[%s3867_s23 + $0x10] sm:$0xff] %vm3027_vm1, %v3021_v24  ;;  %v3024_v27 = vld [vmem:[%s3847_s9 + $0x28] sm:$0xff]  ;;  %3031 = vst.msk [vmem:[%s3867_s23 + $0x18] sm:$0xff] %vm3027_vm1, %v3022_v25  ;;  %v3025_v28 = vld [vmem:[%s3847_s9 + $0x30] sm:$0xff] }
 0x271   : > { %3032 = vst.msk [vmem:[%s3867_s23 + $0x20] sm:$0xff] %vm3027_vm1, %v3023_v26  ;;  %3033 = vst.msk [vmem:[%s3867_s23 + $0x28] sm:$0xff] %vm3027_vm1, %v3024_v27  ;;  %v3026_v29 = vld [vmem:[%s3847_s9 + $0x38] sm:$0xff] }
 0x272   : > { %3034 = vst.msk [vmem:[%s3867_s23 + $0x30] sm:$0xff] %vm3027_vm1, %v3025_v28  ;;  %3035 = vst.msk [vmem:[%s3867_s23 + $0x38] sm:$0xff] %vm3027_vm1, %v3026_v29 }
 0x273 PF: > { %s3141_s6 = sshll.u32 %s3767_s17, 10  ;;  %s3050_s20 = sshll.u32 %s3867_s23, 4  ;;  %s4258_s20 = int_to_ptr.vmem [resolvable:$true] %s3050_s20 }
 0x274   : > { %s4255_s18 = scalar_lea.hbm %s4303_s2, %s3141_s6  ;;  %s3037_s9 = scalar_lea.sflag [#allocation6], %s3843_s30 }
 0x275   : > { %s3653_s21 = scalar_lea.vmem %s4258_s20, 1024  ;;  %p4313_p4 = scmp.ne.s32.totalorder %s4308_s25, 0 }
 0x276   : > { %p3654_p3 = scmp.ne.s32.totalorder %s4258_s20, %s3653_s21  ;;  %s3725_s24 = smov [#allocation7]  }
 0x277   : > { %s3657_s27 = sshll.u32 %s3725_s24, 4  ;;  %s3658_s27 = int_to_ptr.vmem [resolvable:$false] %s3657_s27 }
 0x278   : > { %p3655_p9 = pnand %p3654_p3, %p4313_p4  ;;  %s3659_s17 = scalar_lea.vmem %s3658_s27, 2048 }
 0x279   : > { %p3660_p12 = scmp.lt.s32.totalorder %s4258_s20, %s3658_s27  ;;  %p3661_p13 = scmp.lt.s32.totalorder %s3659_s17, %s3653_s21 }
 0x27a   : > { %p3656_p10 = pneg %p3655_p9 }
 0x27b   : > { %p3662_p1 = por %p3661_p13, %p3660_p12 }
 0x27d   : > { %p3663_p5 = pnand %p3662_p1, %p3656_p10 }
 0x27f   : > { %3666 = shalt.err (!%p3663_p5)
}
 0x280   : > { %s3667_s23 = scalar_lea.hbm %s4255_s18, 1024  ;;  %s3671_s3 = scalar_lea.hbm %s4303_s2, 2048 }
 0x281   : > { %p3668_p7 = scmp.ne.s32.totalorder %s4255_s18, %s3667_s23  ;;  %p3672_p8 = scmp.lt.s32.totalorder %s4255_s18, %s4303_s2 }
 0x282   : > { %p3673_p11 = scmp.lt.s32.totalorder %s3671_s3, %s3667_s23 }
 0x283   : > { %p3669_p0 = pnand %p3668_p7, %p4313_p4 }
 0x284   : > { %p3674_p2 = por %p3673_p11, %p3672_p8 }
 0x285   : > { %p3670_p6 = pneg %p3669_p0 }
 0x287   : > { %p3675_p3 = pnand %p3674_p2, %p3670_p6 }
 0x289   : > { %3678 = shalt.err (!%p3675_p3)
}
 0x28a   : > { %s3726_s7 = smov 128   ;;  %s3727_s8 = smov 8  }
 0x28b   : > { %3564 = dma.vmem_to_hbm [thread:$0]  (%p4313_p4), %s4258_s20, 1024, %s4255_s18, %s3037_s9, %s3726_s7, %s3726_s7, %s3727_s8  }
 0x28c PF: > { %s3065_s10 = sand.u32 1, %s3707_s14   ;;  %p4314_p9 = scmp.ne.s32.totalorder %s4309_s26, 0 }
 0x28d   : > { %p4315_p10 = scmp.ge.s32.totalorder %s3719_s16, 2  ;;  %s3066_s12 = scalar_lea.sflag [#allocation6], %s3065_s10 }
 0x28f   : > { %p3571_p12 = pnand %p4315_p10, %p4314_p9 }
 0x291   : > { %p3572_p13 = pneg %p3571_p12 }
 0x293   : > { %3702 = dma.done.wait (%p3572_p13), %s3066_s12, 1024  }
 0x294   : > { %3704 = vsyncadd (%p3572_p13), %s3066_s12, 4294966272  ;;  %p21_p1 = scmp.ge.s32.totalorder %s3771_s19, 4   ;;  %s4316_s14 = smov %s3711_s0 }
 0x295   : > { %s4317_s0 = smov %s3715_s15  ;;  %s4318_s15 = smov %s3783_s22 }
 0x296   : > { %s4319_s16 = smov %s3771_s19  ;;  %23 = sbr.rel (!%p21_p1) target bundleno = 20 (0x14), region = 77 }
 0x29b   :  { %3071 = vsyncpa [#allocation5], 1 }
 0x29c   :  { %3073 = vsyncpa [#allocation5 + $0x1], 1 }
 0x29d   :  { %3074 = vsyncpa [#allocation6], 1 }
 0x29e   :  { %3076 = vsyncpa [#allocation6 + $0x1], 1 }

</bundles_post_ra>
